<compile_context>
chip_gen: v6e
topology: v6e:2x2x1
jax: 0.10.0
libtpu: 0.0.40
codegen_flags: <defaults>
</compile_context>

<pallas_src>
import functools

import numpy as np
import jax
import jax.numpy as jnp
from jax.experimental import pallas as pl
from jax.experimental.pallas import tpu as pltpu


_LN_EPS = 1e-5                      # PyTorch nn.LayerNorm default eps
_POOLS = ((5, 2), (13, 6), (7, 3))  # (kernel_size, padding), stride = 1


def _round_up(x, m):
    return (x + m - 1) // m * m


def _pool_matrix_np(L, k, p):
    """(L, L) float64 matrix s.t. x @ M == AvgPool1d(k, stride=1, padding=p)(x)
    along the last axis with count_include_pad=True (divisor always k)."""
    assert k == 2 * p + 1, "band construction assumes 'same' pooling (k == 2p+1)"
    j = np.arange(L)[:, None]   # input index
    i = np.arange(L)[None, :]   # output index
    return (np.abs(j - i) <= p).astype(np.float64) / float(k)


@functools.lru_cache(maxsize=16)
def _fused_constants(L, pack):
    """Host-side (numpy float64) constant fold of the whole linear prefix.

    Returns:
      m_c : (pack*L, pack*L) f32 -- pooling cascade with the LayerNorm mean
            subtraction folded in, block-diagonal over `pack` segments.
      a   : (pack*L, pack*L) f32 -- per-L-segment averaging matrix (reduces AND
            re-broadcasts within each segment), or None when pack == 1.
    """
    m = np.eye(L)
    for k, p in _POOLS:
        m = m @ _pool_matrix_np(L, k, p)
    # centered = pooled - mean(pooled)  ==  x @ (M (I - 11^T / L))
    m_c = m @ (np.eye(L) - np.full((L, L), 1.0 / L))
    if pack > 1:
        m_c = np.kron(np.eye(pack), m_c)
        a = np.kron(np.eye(pack), np.full((L, L), 1.0 / L))
        return m_c.astype(np.float32), a.astype(np.float32)
    return m_c.astype(np.float32), None


def _pack_factor(R, L):
    """Largest p <= 128//L dividing R: pack p rows into one 128-wide lane row."""
    cap = max(1, 128 // L)
    p = 1
    for d in range(2, cap + 1):
        if R % d == 0:
            p = d
    return p


def _vmem_capacity_bytes():
    try:
        return int(pltpu.get_tpu_info().vmem_capacity_bytes)
    except Exception:
        return 64 << 20     # v7x per-TC VMEM: smallest of the target chips


def _pick_row_tile(Rp, W, itemsize, vmem_cap):
    """Row tile: big enough to amortize the ~0.35us/step grid overhead, small
    enough to double-buffer in VMEM, and >= 2 grid steps when possible so the
    'parallel' axis can be sharded across v7x's two TensorCores."""
    if Rp <= 8:
        return Rp                          # single (full-extent) block
    per_row = 4 * W * itemsize             # x + out, double-buffered
    const = 4 * W * W * 4                  # m (+ a), double-buffered, f32
    budget = max(vmem_cap // 2 - const, per_row * 8)
    t = min(budget // per_row, 1024, _round_up(pl.cdiv(Rp, 2), 8))
    return max(8, int(t) // 8 * 8)


# ------------------------------- kernels ------------------------------------

def _pre_block_kernel(x_ref, m_ref, g_ref, b_ref, o_ref, *, precision):
    # Pooling cascade + LayerNorm mean subtraction: ONE MXU matmul.
    centered = jnp.dot(x_ref[...], m_ref[...], precision=precision,
                       preferred_element_type=jnp.float32)
    # E[centered] == 0 by construction, so var == E[centered^2]
    # (single cross-lane reduction, no serial mean->center->var chain).
    var = jnp.mean(centered * centered, axis=-1, keepdims=True)
    inv = jax.lax.rsqrt(var + _LN_EPS)
    o_ref[...] = (centered * inv * g_ref[...] + b_ref[...]).astype(o_ref.dtype)


def _pre_block_kernel_packed(x_ref, m_ref, a_ref, g_ref, b_ref, o_ref, *, precision):
    # `pack` independent length-L rows sit side by side along the 128-wide lane
    # axis; m_ref is block-diagonal so one lane-dense matmul handles them all.
    centered = jnp.dot(x_ref[...], m_ref[...], precision=precision,
                       preferred_element_type=jnp.float32)
    # Per-L-segment E[centered^2], reduced AND re-broadcast within each segment
    # by the block-diagonal (1/L) matrix (E[centered] == 0 by construction).
    ex2 = jnp.dot(centered * centered, a_ref[...], precision=precision,
                  preferred_element_type=jnp.float32)
    inv = jax.lax.rsqrt(ex2 + _LN_EPS)
    o_ref[...] = (centered * inv * g_ref[...] + b_ref[...]).astype(o_ref.dtype)


# ------------------------------- wrapper ------------------------------------

def pre_block_forward(x, gamma, beta, *, precision=None):
    """pre_block forward: pool1 -> pool2 -> pool3 -> LayerNorm(L).

    x     : (N, C, L) in its native dtype (no wrapper-side casts or pads)
    gamma : (L,) LayerNorm weight,  beta : (L,) LayerNorm bias
    returns (N, C, L) in x.dtype
    """
    N, C, L = x.shape
    assert gamma.shape == (L,) and beta.shape == (L,)
    R = N * C

    # Lane packing for small L (fills the 128-wide lane axis / MXU).
    pack = _pack_factor(R, L)
    Rp, W = R // pack, pack * L

    x2 = x.reshape(Rp, W)                     # free contiguous reshape, native dtype
    m_np, a_np = _fused_constants(L, pack)
    m_dtype = jnp.bfloat16 if x.dtype == jnp.bfloat16 else jnp.float32
    m = jnp.asarray(m_np, dtype=m_dtype)
    g2 = jnp.tile(gamma.astype(jnp.float32), pack).reshape(1, W)
    b2 = jnp.tile(beta.astype(jnp.float32), pack).reshape(1, W)

    if precision is None:
        # f32 inputs: exact multi-pass MXU matmul so tight (1e-4) tolerances
        # hold after LayerNorm; bf16 inputs: native single-pass bf16 fast path.
        precision = (jax.lax.Precision.HIGHEST if x.dtype == jnp.float32
                     else jax.lax.Precision.DEFAULT)

    itemsize = x.dtype.itemsize
    vmem_cap = _vmem_capacity_bytes()
    r_tile = _pick_row_tile(Rp, W, itemsize, vmem_cap)
    grid = (pl.cdiv(Rp, r_tile),)             # partial last block -> no HBM pad pass

    n_const = 2 if a_np is not None else 1
    needed = (4 * r_tile * W * itemsize                         # x + out, 2 bufs each
              + 2 * n_const * W * W * np.dtype(m_dtype).itemsize  # constants, 2 bufs
              + 8 * W * 4)                                      # gamma, beta
    vmem_limit = int(min(max(2 * needed, 16 << 20), int(0.9 * vmem_cap)))

    common = dict(
        out_shape=jax.ShapeDtypeStruct((Rp, W), x.dtype),
        compiler_params=pltpu.CompilerParams(
            dimension_semantics=("parallel",),
            vmem_limit_bytes=vmem_limit,
        ),
    )
    row_spec = pl.BlockSpec((r_tile, W), lambda i: (i, 0))
    const_spec = pl.BlockSpec((W, W), lambda i: (0, 0))
    vec_spec = pl.BlockSpec((1, W), lambda i: (0, 0))

    if a_np is not None:
        a = jnp.asarray(a_np, dtype=jnp.float32)
        out = pl.pallas_call(
            functools.partial(_pre_block_kernel_packed, precision=precision),
            grid_spec=pltpu.PrefetchScalarGridSpec(
                num_scalar_prefetch=0, grid=grid,
                in_specs=[row_spec, const_spec, const_spec, vec_spec, vec_spec],
                out_specs=row_spec),
            **common,
        )(x2, m, a, g2, b2)
    else:
        out = pl.pallas_call(
            functools.partial(_pre_block_kernel, precision=precision),
            grid_spec=pltpu.PrefetchScalarGridSpec(
                num_scalar_prefetch=0, grid=grid,
                in_specs=[row_spec, const_spec, vec_spec, vec_spec],
                out_specs=row_spec),
            **common,
        )(x2, m, g2, b2)

    return out.reshape(N, C, L)


# --------------------------- pure-JAX reference ------------------------------

def _avg_pool1d_ref(x, k, p):
    L = x.shape[-1]
    xp = jnp.pad(x, ((0, 0), (0, 0), (p, p)))
    acc = jnp.zeros_like(x)
    for i in range(k):
        acc = acc + xp[:, :, i:i + L]
    return acc / k


def _reference(x, gamma, beta):
    y = x.astype(jnp.float32)
    for k, p in _POOLS:
        y = _avg_pool1d_ref(y, k, p)
    mean = y.mean(-1, keepdims=True)
    var = ((y - mean) ** 2).mean(-1, keepdims=True)
    y = (y - mean) * jax.lax.rsqrt(var + _LN_EPS)
    return y * gamma.reshape(1, 1, -1) + beta.reshape(1, 1, -1)


if __name__ == "__main__":
    key = jax.random.PRNGKey(0)
    kx, kg, kb = jax.random.split(key, 3)

    # Small shape consistent with the module: batch=2, channels=4, L=16.
    # Exercises the lane-packed path (pack=8 -> one 128-wide lane row).
    N, C, L = 2, 4, 16
    x = jax.random.normal(kx, (N, C, L), dtype=jnp.float32)
    gamma = 1.0 + 0.1 * jax.random.normal(kg, (L,), dtype=jnp.float32)
    beta = 0.1 * jax.random.normal(kb, (L,), dtype=jnp.float32)

    out = jax.block_until_ready(pre_block_forward(x, gamma, beta))
    ref = _reference(x, gamma, beta)
    assert out.shape == (N, C, L) and out.dtype == x.dtype
    err = float(jnp.max(jnp.abs(out - ref)))
    assert jnp.allclose(out, ref, atol=1e-4, rtol=1e-4), f"packed path mismatch, max_err={err}"

    # Also exercise the unpacked (L >= 128) path.
    L2 = 128
    x2 = jax.random.normal(kx, (N, C, L2), dtype=jnp.float32)
    g2 = 1.0 + 0.1 * jax.random.normal(kg, (L2,), dtype=jnp.float32)
    b2 = 0.1 * jax.random.normal(kb, (L2,), dtype=jnp.float32)
    out2 = jax.block_until_ready(pre_block_forward(x2, g2, b2))
    ref2 = _reference(x2, g2, b2)
    err2 = float(jnp.max(jnp.abs(out2 - ref2)))
    assert jnp.allclose(out2, ref2, atol=1e-4, rtol=1e-4), f"plain path mismatch, max_err={err2}"

    print("KERNEL_OK")
</pallas_src>

<mosaic_0001>
module attributes {stable_mosaic.version = 11 : i64} {
  func.func @_pre_block_kernel_packed(%arg0: i32, %arg1: memref<1x128xf32, #tpu.memory_space<vmem>>, %arg2: memref<128x128xf32, #tpu.memory_space<vmem>>, %arg3: memref<128x128xf32, #tpu.memory_space<vmem>>, %arg4: memref<1x128xf32, #tpu.memory_space<vmem>>, %arg5: memref<1x128xf32, #tpu.memory_space<vmem>>, %arg6: memref<1x128xf32, #tpu.memory_space<vmem>>) attributes {dimension_semantics = [#tpu.dimension_semantics<parallel>], iteration_bounds = array<i64: 1>, scalar_prefetch = 0 : i64, scratch_operands = 0 : i64, tpu.core_type = #tpu.core_type<tc>, window_params = [{transform_indices = @transform_0, window_bounds = array<i64: 1, 128>}, {pipeline_mode = #tpu.pipeline_mode<synchronous>, transform_indices = @transform_1, window_bounds = array<i64: 128, 128>}, {pipeline_mode = #tpu.pipeline_mode<synchronous>, transform_indices = @transform_2, window_bounds = array<i64: 128, 128>}, {pipeline_mode = #tpu.pipeline_mode<synchronous>, transform_indices = @transform_3, window_bounds = array<i64: 1, 128>}, {pipeline_mode = #tpu.pipeline_mode<synchronous>, transform_indices = @transform_4, window_bounds = array<i64: 1, 128>}, {transform_indices = @transform_5, window_bounds = array<i64: 1, 128>}]} {
    %c0 = arith.constant 0 : index
    %c0_0 = arith.constant 0 : index
    %0 = vector.load %arg1[%c0, %c0_0] : memref<1x128xf32, #tpu.memory_space<vmem>>, vector<1x128xf32>
    %c0_1 = arith.constant 0 : index
    %c0_2 = arith.constant 0 : index
    %1 = vector.load %arg2[%c0_1, %c0_2] : memref<128x128xf32, #tpu.memory_space<vmem>>, vector<128x128xf32>
    %cst = arith.constant dense<0.000000e+00> : vector<1x128xf32>
    %2 = tpu.matmul %0, %1, %cst {dimension_numbers = #tpu.dot_dimension_numbers<[1], [0], [0], [1], [0, 0, 1, 1], [], []>, precision = #tpu.contract_precision<fp32>} : vector<1x128xf32>, vector<128x128xf32>, vector<1x128xf32> -> vector<1x128xf32>
    %3 = arith.mulf %2, %2 : vector<1x128xf32>
    %c0_3 = arith.constant 0 : index
    %c0_4 = arith.constant 0 : index
    %4 = vector.load %arg3[%c0_3, %c0_4] : memref<128x128xf32, #tpu.memory_space<vmem>>, vector<128x128xf32>
    %cst_5 = arith.constant dense<0.000000e+00> : vector<1x128xf32>
    %5 = tpu.matmul %3, %4, %cst_5 {dimension_numbers = #tpu.dot_dimension_numbers<[1], [0], [0], [1], [0, 0, 1, 1], [], []>, precision = #tpu.contract_precision<fp32>} : vector<1x128xf32>, vector<128x128xf32>, vector<1x128xf32> -> vector<1x128xf32>
    %cst_6 = arith.constant 9.99999974E-6 : f32
    %6 = vector.broadcast %cst_6 : f32 to vector<1x128xf32>
    %7 = arith.addf %5, %6 : vector<1x128xf32>
    %8 = math.rsqrt %7 : vector<1x128xf32>
    %9 = arith.mulf %2, %8 : vector<1x128xf32>
    %c0_7 = arith.constant 0 : index
    %c0_8 = arith.constant 0 : index
    %10 = vector.load %arg4[%c0_7, %c0_8] : memref<1x128xf32, #tpu.memory_space<vmem>>, vector<1x128xf32>
    %11 = arith.mulf %9, %10 : vector<1x128xf32>
    %c0_9 = arith.constant 0 : index
    %c0_10 = arith.constant 0 : index
    %12 = vector.load %arg5[%c0_9, %c0_10] : memref<1x128xf32, #tpu.memory_space<vmem>>, vector<1x128xf32>
    %13 = arith.addf %11, %12 : vector<1x128xf32>
    %c0_11 = arith.constant 0 : index
    %c0_12 = arith.constant 0 : index
    %14 = vector.load %arg6[%c0_11, %c0_12] : memref<1x128xf32, #tpu.memory_space<vmem>>, vector<1x128xf32>
    tpu.vector_store %arg6[%c0_11, %c0_12], %13 {strides = array<i32>} : memref<1x128xf32, #tpu.memory_space<vmem>>, vector<1x128xf32>,
    return
  }
  func.func @transform_0(%arg0: i32) -> (i32, i32) {
    %c0_i32 = arith.constant 0 : i32
    %c0_i32_0 = arith.constant 0 : i32
    return %arg0, %c0_i32 : i32, i32
  }
  func.func @transform_1(%arg0: i32) -> (i32, i32) {
    %c0_i32 = arith.constant 0 : i32
    %c0_i32_0 = arith.constant 0 : i32
    %c0_i32_1 = arith.constant 0 : i32
    return %c0_i32, %c0_i32_0 : i32, i32
  }
  func.func @transform_2(%arg0: i32) -> (i32, i32) {
    %c0_i32 = arith.constant 0 : i32
    %c0_i32_0 = arith.constant 0 : i32
    %c0_i32_1 = arith.constant 0 : i32
    return %c0_i32, %c0_i32_0 : i32, i32
  }
  func.func @transform_3(%arg0: i32) -> (i32, i32) {
    %c0_i32 = arith.constant 0 : i32
    %c0_i32_0 = arith.constant 0 : i32
    %c0_i32_1 = arith.constant 0 : i32
    return %c0_i32, %c0_i32_0 : i32, i32
  }
  func.func @transform_4(%arg0: i32) -> (i32, i32) {
    %c0_i32 = arith.constant 0 : i32
    %c0_i32_0 = arith.constant 0 : i32
    %c0_i32_1 = arith.constant 0 : i32
    return %c0_i32, %c0_i32_0 : i32, i32
  }
  func.func @transform_5(%arg0: i32) -> (i32, i32) {
    %c0_i32 = arith.constant 0 : i32
    %c0_i32_0 = arith.constant 0 : i32
    return %arg0, %c0_i32 : i32, i32
  }
}

</mosaic_0001>

<bundles_post_ra>
// kernel: tpu_custom_call.1
= control target key start
LH: loop header
LB: loop body
LE: loop exit
PB: predicated region body
PF: predicated region fallthrough
CT: control target
= control target key end

     0   :  { %10 = vsyncpa [#allocation3], 0  ;;  %s2902_s0 = inlined_call_operand.hbm [shape: f32[1,128], index: 0, kind: input, shape index: {}]   ;;  %s2903_s1 = inlined_call_operand.hbm [shape: f32[128,128], index: 1, kind: input, shape index: {}]   ;;  %s2904_s2 = inlined_call_operand.hbm [shape: f32[128,128], index: 2, kind: input, shape index: {}]   ;;  %s2905_s3 = inlined_call_operand.vmem [shape: f32[1,128], index: 3, kind: input, shape index: {}]   ;;  %s2906_s4 = inlined_call_operand.vmem [shape: f32[1,128], index: 4, kind: input, shape index: {}]   ;;  %s2907_s5 = inlined_call_operand.hbm [shape: f32[1,128], index: 5, kind: output, shape index: {}]  }
   0x1   :  { %11 = vsyncpa [#allocation6], 0 }
   0x2   :  { %12 = vsyncpa [#allocation4], 0  ;;  %s2119_s18 = smov [#allocation5]  }
   0x3   :  { %s28_s19 = sshll.u32 %s2119_s18, 4  ;;  %s29_s19 = int_to_ptr.vmem [resolvable:$true] %s28_s19 }
   0x4   :  { %s2041_s20 = scalar_lea.vmem %s29_s19, 2048  ;;  %p2046_p1 = scmp.lt.s32.totalorder %s29_s19, %s29_s19 }
   0x5   :  { %p2042_p0 = scmp.ne.s32.totalorder %s29_s19, %s2041_s20  ;;  %p2047_p2 = scmp.lt.s32.totalorder %s2041_s20, %s2041_s20 }
   0x7   :  { %p2048_p3 = por %p2047_p2, %p2046_p1 }
   0x9   :  { %p2049_p4 = pnand %p2048_p3, %p2042_p0 }
   0xb   :  { %2052 = shalt.err (!%p2049_p4)
}
   0xc   :  { %s2120_s21 = smov 128   ;;  %s2121_s22 = smov 8  }
   0xd   :  { %34 = dma.hbm_to_vmem [thread:$0]  %s2903_s1, 2048, %s29_s19, [#allocation6], %s2120_s21, %s2120_s21, %s2121_s22  }
   0xe   :  { %s2122_s25 = smov [#allocation2]   ;;  %s2123_s27 = smov [#allocation7]  }
   0xf   :  { %s19_s26 = sshll.u32 %s2122_s25, 4  ;;  %s40_s28 = sshll.u32 %s2123_s27, 4  ;;  %s20_s26 = int_to_ptr.vmem [resolvable:$true] %s19_s26  ;;  %s41_s28 = int_to_ptr.vmem [resolvable:$true] %s40_s28 }
  0x10   :  { %s2061_s29 = scalar_lea.vmem %s20_s26, 16  ;;  %s2065_s30 = scalar_lea.vmem %s20_s26, 32 }
  0x11   :  { %p2062_p5 = scmp.ne.s32.totalorder %s20_s26, %s2061_s29  ;;  %p2066_p6 = scmp.lt.s32.totalorder %s20_s26, %s20_s26 }
  0x12   :  { %p2067_p7 = scmp.lt.s32.totalorder %s2065_s30, %s2061_s29 }
  0x14   :  { %p2068_p8 = por %p2067_p7, %p2066_p6 }
  0x16   :  { %p2069_p9 = pnand %p2068_p8, %p2062_p5 }
  0x18   :  { %2072 = shalt.err (!%p2069_p9)
}
  0x19   :  { %22 = dma.hbm_to_vmem [thread:$0]  %s2902_s0, 16, %s20_s26, [#allocation3]  }
  0x1a   :  { %s2081_s8 = scalar_lea.vmem %s41_s28, 2048  ;;  %p2086_p11 = scmp.lt.s32.totalorder %s41_s28, %s41_s28 }
  0x1b   :  { %p2082_p10 = scmp.ne.s32.totalorder %s41_s28, %s2081_s8  ;;  %p2087_p12 = scmp.lt.s32.totalorder %s2081_s8, %s2081_s8 }
  0x1d   :  { %p2088_p13 = por %p2087_p12, %p2086_p11 }
  0x1f   :  { %p2089_p0 = pnand %p2088_p13, %p2082_p10 }
  0x21   :  { %2092 = shalt.err (!%p2089_p0)
}
  0x22   :  { %46 = dma.hbm_to_vmem [thread:$0]  %s2904_s2, 2048, %s41_s28, [#allocation6], %s2120_s21, %s2120_s21, %s2121_s22  }
  0x23   :  { %2113 = dma.done.wait [#allocation3], 16  }
  0x24   :  { %2114 = vsyncadd [#allocation3], 4294967280 }
  0x25   :  { %2115 = dma.done.wait [#allocation6], 4096  }
  0x26   :  { %2116 = vsyncadd [#allocation6], 4294963200  ;;  %v2124_v0 = vmov 0.0   ;;  %vm2125_vm0 = vmmov 0   ;;  %v76_v1 = vld [vmem:[#allocation5 + $0x78] sm:$0xff]  ;;  %v75_v2 = vld [vmem:[#allocation5 + $0x70] sm:$0xff] }
  0x27   :  { %1603 = vmatprep.subr.mxu0 %v2124_v0  ;;  %1638 = vmatprep.subr.mxu1 %v2124_v0  ;;  %v74_v3 = vld [vmem:[#allocation5 + $0x68] sm:$0xff]  ;;  %v2172_v4 = vand.u32 4294901760, %v76_v1  ;;  %v2174_v5 = vand.u32 4294901760, %v75_v2  ;;  %v73_v7 = vld [vmem:[#allocation5 + $0x60] sm:$0xff]  ;;  %v72_v8 = vld [vmem:[#allocation5 + $0x58] sm:$0xff]  ;;  %s2126_s12 = smov [#allocation8]  }
  0x28   :  { %1635 = vmatprep.mubr.msk.f32.mxu0 %vm2125_vm0, %v2124_v0  ;;  %1670 = vmatprep.mubr.msk.f32.mxu1 %vm2125_vm0, %v2124_v0  ;;  %v2176_v6 = vand.u32 4294901760, %v74_v3  ;;  %v71_v9 = vld [vmem:[#allocation5 + $0x50] sm:$0xff]  ;;  %v2178_v10 = vand.u32 4294901760, %v73_v7  ;;  %v2180_v11 = vand.u32 4294901760, %v72_v8  ;;  %v70_v13 = vld [vmem:[#allocation5 + $0x48] sm:$0xff]  ;;  %v69_v14 = vld [vmem:[#allocation5 + $0x40] sm:$0xff] }
  0x29   :  { %v2182_v12 = vand.u32 4294901760, %v71_v9  ;;  %1604 = vmatpush3.msra.mxu0 %v2172_v4  ;;  %v2186_v15 = vsub.f32 %v76_v1, %v2172_v4  ;;  %v2189_v16 = vsub.f32 %v75_v2, %v2174_v5  ;;  %v2191_v17 = vand.u32 4294901760, %v70_v13  ;;  %v68_v19 = vld [vmem:[#allocation5 + $0x38] sm:$0xff]  ;;  %v67_v26 = vld [vmem:[#allocation5 + $0x30] sm:$0xff]  ;;  %v66_v36 = vld [vmem:[#allocation5 + $0x28] sm:$0xff]  ;;  %s1389_s13 = sshll.u32 %s2126_s12, 4  ;;  %s1390_s13 = int_to_ptr.vmem [resolvable:$true] %s1389_s13 }
  0x2a   :  { %v2194_v18 = vsub.f32 %v74_v3, %v2176_v6  ;;  %1605 = vmatprep.subr.mxu0 %v2124_v0  ;;  %v2198_v20 = vsub.f32 %v73_v7, %v2178_v10  ;;  %v2201_v21 = vsub.f32 %v72_v8, %v2180_v11  ;;  %v2207_v25 = vand.u32 4294901760, %v69_v14  ;;  %v65_v41 = vld [vmem:[#allocation5 + $0x20] sm:$0xff]  ;;  %v64_v49 = vld [vmem:[#allocation5 + $0x18] sm:$0xff]  ;;  %v63_v54 = vld [vmem:[#allocation5 + $0x10] sm:$0xff]  ;;  %s2093_s14 = scalar_lea.vmem %s1390_s13, 16  ;;  %s2097_s15 = scalar_lea.vmem %s1390_s13, 32 }
  0x2b   :  { %1606 = vmatpush3.msra.mxu0 %v2174_v5  ;;  %v171_v22 = vand.u32 4294901760, %v2186_v15  ;;  %v178_v23 = vand.u32 4294901760, %v2189_v16  ;;  %v2211_v28 = vand.u32 4294901760, %v68_v19  ;;  %v2215_v30 = vsub.f32 %v71_v9, %v2182_v12  ;;  %v60_v50 = vld [vmem:[#allocation2] sm:$0x1]  ;;  %v62_v60 = vld [vmem:[#allocation5 + $0x8] sm:$0xff]  ;;  %p2094_p1 = scmp.ne.s32.totalorder %s1390_s13, %s2093_s14  ;;  %p2098_p2 = scmp.lt.s32.totalorder %s1390_s13, %s1390_s13 }
  0x2c   :  { %v185_v24 = vand.u32 4294901760, %v2194_v18  ;;  %1607 = vmatprep.subr.mxu0 %v2124_v0  ;;  %v192_v27 = vand.u32 4294901760, %v2198_v20  ;;  %v199_v29 = vand.u32 4294901760, %v2201_v21  ;;  %v2228_v34 = vsub.f32 %v70_v13, %v2191_v17  ;;  %v61_v7 = vld [vmem:[#allocation5] sm:$0xff]  ;;  %p2099_p3 = scmp.lt.s32.totalorder %s2097_s15, %s2093_s14 }
  0x2d   :  { %1608 = vmatpush3.msra.mxu0 %v2176_v6  ;;  %v172_v31 = vsub.f32 %v2186_v15, %v171_v22  ;;  %v179_v32 = vsub.f32 %v2189_v16, %v178_v23  ;;  %v2231_v35 = vand.u32 4294901760, %v67_v26  ;;  %v206_v40 = vand.u32 4294901760, %v2215_v30 }
  0x2e   :  { %v186_v33 = vsub.f32 %v2194_v18, %v185_v24  ;;  %1609 = vmatprep.subr.mxu0 %v2124_v0  ;;  %v193_v39 = vsub.f32 %v2198_v20, %v192_v27  ;;  %v200_v42 = vsub.f32 %v2201_v21, %v199_v29  ;;  %v2243_v43 = vsub.f32 %v69_v14, %v2207_v25  ;;  %p2100_p4 = por %p2099_p3, %p2098_p2 }
  0x2f   :  { %1610 = vmatpush3.msra.mxu0 %v2178_v10  ;;  %v173_v37 = vand.u32 4294901760, %v172_v31  ;;  %v180_v38 = vand.u32 4294901760, %v179_v32  ;;  %v2246_v45 = vand.u32 4294901760, %v66_v36  ;;  %v213_v46 = vand.u32 4294901760, %v2228_v34 }
  0x30   :  { %1611 = vmatprep.subr.mxu0 %v2124_v0  ;;  %v187_v44 = vand.u32 4294901760, %v186_v33  ;;  %v2250_v47 = vsub.f32 %v68_v19, %v2211_v28  ;;  %v2254_v48 = vand.u32 4294901760, %v65_v41  ;;  %v194_v51 = vand.u32 4294901760, %v193_v39  ;;  %p2101_p5 = pnand %p2100_p4, %p2094_p1 }
  0x31   :  { %1612 = vmatpush3.msra.mxu0 %v2180_v11  ;;  %1639 = vmatpush3.msra.mxu1 %v173_v37  ;;  %v207_v52 = vsub.f32 %v2215_v30, %v206_v40  ;;  %v220_v53 = vand.u32 4294901760, %v2243_v43  ;;  %v2262_v55 = vsub.f32 %v67_v26, %v2231_v35  ;;  %v201_v56 = vand.u32 4294901760, %v200_v42 }
  0x32   :  { %1613 = vmatprep.subr.mxu0 %v2124_v0  ;;  %1640 = vmatprep.subr.mxu1 %v2124_v0  ;;  %v227_v57 = vand.u32 4294901760, %v2250_v47  ;;  %v214_v58 = vsub.f32 %v2228_v34, %v213_v46  ;;  %v2271_v59 = vand.u32 4294901760, %v64_v49  ;;  %v2274_v61 = vsub.f32 %v66_v36, %v2246_v45 }
  0x33   :  { %1614 = vmatpush3.msra.mxu0 %v2182_v12  ;;  %1641 = vmatpush3.msra.mxu1 %v180_v38  ;;  %v2276_v62 = vand.u32 4294901760, %v60_v50  ;;  %v2280_v63 = vand.u32 4294901760, %v63_v54  ;;  %v208_v1 = vand.u32 4294901760, %v207_v52  ;;  %v221_v2 = vsub.f32 %v2243_v43, %v220_v53 }
  0x34   :  { %1615 = vmatprep.subr.mxu0 %v2124_v0  ;;  %1642 = vmatprep.subr.mxu1 %v2124_v0  ;;  %v234_v3 = vand.u32 4294901760, %v2262_v55  ;;  %v2288_v8 = vsub.f32 %v65_v41, %v2254_v48  ;;  %v228_v9 = vsub.f32 %v2250_v47, %v227_v57  ;;  %v2295_v13 = vand.u32 4294901760, %v62_v60 }
  0x35   :  { %1616 = vmatpush3.msra.mxu0 %v2191_v17  ;;  %1643 = vmatpush3.msra.mxu1 %v187_v44  ;;  %v215_v14 = vand.u32 4294901760, %v214_v58  ;;  %v241_v19 = vand.u32 4294901760, %v2274_v61  ;;  %v2300_v26 = vsub.f32 %v60_v50, %v2276_v62  ;;  %v2303_v31 = vsub.f32 %v64_v49, %v2271_v59 }
  0x36   :  { %1617 = vmatprep.subr.mxu0 %v2124_v0  ;;  %1644 = vmatprep.subr.mxu1 %v2124_v0  ;;  %v2307_v32 = vand.u32 4294901760, %v61_v7  ;;  %v222_v33 = vand.u32 4294901760, %v221_v2  ;;  %v235_v36 = vsub.f32 %v2262_v55, %v234_v3  ;;  %v248_v37 = vand.u32 4294901760, %v2288_v8 }
  0x37   :  { %1618 = vmatpush3.msra.mxu0 %v2207_v25  ;;  %1645 = vmatpush3.msra.mxu1 %v194_v51  ;;  %v2315_v38 = vsub.f32 %v63_v54, %v2280_v63  ;;  %v229_v39 = vand.u32 4294901760, %v228_v9  ;;  %v242_v41 = vsub.f32 %v2274_v61, %v241_v19  ;;  %v160_v42 = vand.u32 4294901760, %v2300_v26 }
  0x38   :  { %1619 = vmatprep.subr.mxu0 %v2124_v0  ;;  %1646 = vmatprep.subr.mxu1 %v2124_v0  ;;  %v255_v44 = vand.u32 4294901760, %v2303_v31  ;;  %v2326_v49 = vsub.f32 %v62_v60, %v2295_v13  ;;  %v236_v50 = vand.u32 4294901760, %v235_v36  ;;  %v249_v51 = vsub.f32 %v2288_v8, %v248_v37 }
  0x39   :  { %1620 = vmatpush3.msra.mxu0 %v2211_v28  ;;  %1647 = vmatpush3.msra.mxu1 %v201_v56  ;;  %v262_v52 = vand.u32 4294901760, %v2315_v38  ;;  %v2336_v54 = vsub.f32 %v61_v7, %v2307_v32  ;;  %v243_v56 = vand.u32 4294901760, %v242_v41  ;;  %v161_v58 = vsub.f32 %v2300_v26, %v160_v42 }
  0x3a   :  { %1621 = vmatprep.subr.mxu0 %v2124_v0  ;;  %1648 = vmatprep.subr.mxu1 %v2124_v0  ;;  %v256_v60 = vsub.f32 %v2303_v31, %v255_v44  ;;  %v250_v2 = vand.u32 4294901760, %v249_v51 }
  0x3b   :  { %1622 = vmatpush3.msra.mxu0 %v2231_v35  ;;  %1649 = vmatpush3.msra.mxu1 %v208_v1  ;;  %v269_v1 = vand.u32 4294901760, %v2326_v49  ;;  %v263_v7 = vsub.f32 %v2315_v38, %v262_v52  ;;  %v276_v9 = vand.u32 4294901760, %v2336_v54 }
  0x3c   :  { %1623 = vmatprep.subr.mxu0 %v2124_v0  ;;  %1650 = vmatprep.subr.mxu1 %v2124_v0 }
  0x3d   :  { %1624 = vmatpush3.msra.mxu0 %v2246_v45  ;;  %1651 = vmatpush3.msra.mxu1 %v215_v14  ;;  %v162_v14 = vand.u32 4294901760, %v161_v58  ;;  %v270_v36 = vsub.f32 %v2326_v49, %v269_v1  ;;  %v277_v41 = vsub.f32 %v2336_v54, %v276_v9  ;;  %v725_v58 = vld [vmem:[#allocation7 + $0x30] sm:$0xff] }
  0x3e   :  { %1625 = vmatprep.subr.mxu0 %v2124_v0  ;;  %1652 = vmatprep.subr.mxu1 %v2124_v0 }
  0x3f   :  { %1626 = vmatpush3.msra.mxu0 %v2254_v48  ;;  %1653 = vmatpush3.msra.mxu1 %v222_v33  ;;  %v257_v33 = vand.u32 4294901760, %v256_v60  ;;  %v278_v51 = vand.u32 4294901760, %v277_v41 }
  0x40   :  { %1627 = vmatprep.subr.mxu0 %v2124_v0  ;;  %1654 = vmatprep.subr.mxu1 %v2124_v0 }
  0x41   :  { %1628 = vmatpush3.msra.mxu0 %v2271_v59  ;;  %1655 = vmatpush3.msra.mxu1 %v229_v39  ;;  %v264_v39 = vand.u32 4294901760, %v263_v7  ;;  %v724_v7 = vld [vmem:[#allocation7 + $0x28] sm:$0xff] }
  0x42   :  { %1629 = vmatprep.subr.mxu0 %v2124_v0  ;;  %1656 = vmatprep.subr.mxu1 %v2124_v0 }
  0x43   :  { %1630 = vmatpush3.msra.mxu0 %v2280_v63  ;;  %1657 = vmatpush3.msra.mxu1 %v236_v50  ;;  %v271_v50 = vand.u32 4294901760, %v270_v36  ;;  %v723_v36 = vld [vmem:[#allocation7 + $0x20] sm:$0xff] }
  0x44   :  { %1631 = vmatprep.subr.mxu0 %v2124_v0  ;;  %1658 = vmatprep.subr.mxu1 %v2124_v0 }
  0x45   :  { %1632 = vmatpush3.msra.mxu0 %v2295_v13  ;;  %1659 = vmatpush3.msra.mxu1 %v243_v56 }
  0x46   :  { %1633 = vmatprep.subr.mxu0 %v2124_v0  ;;  %1660 = vmatprep.subr.mxu1 %v2124_v0 }
  0x47   :  { %1634 = vmatpush3.msra.mxu0 %v2307_v32  ;;  %1661 = vmatpush3.msra.mxu1 %v250_v2  ;;  %v2635_v2 = vand.u32 4294901760, %v725_v58 }
  0x48   :  { %1662 = vmatprep.subr.mxu1 %v2124_v0  ;;  %1673 = vmatprep.subr.mxu0 %v2124_v0 }
  0x49   :  { %1636 = vmatmul.mubr.f32.vlgmr.msra.gmra.mxu0 %v162_v14  ;;  %1663 = vmatpush3.msra.mxu1 %v257_v33  ;;  %v2641_v14 = vsub.f32 %v725_v58, %v2635_v2  ;;  %v2643_v33 = vand.u32 4294901760, %v724_v7 }
  0x4a   :  { %1674 = vmatpush3.msra.mxu0 %v2186_v15  ;;  %1664 = vmatprep.subr.mxu1 %v2124_v0  ;;  %v731_v15 = vld [vmem:[#allocation7 + $0x60] sm:$0xff] }
  0x4b   :  { %1675 = vmatprep.subr.mxu0 %v2124_v0  ;;  %1665 = vmatpush3.msra.mxu1 %v264_v39  ;;  %v892_v41 = vand.u32 4294901760, %v2641_v14 }
  0x4c   :  { %1676 = vmatpush3.msra.mxu0 %v2189_v16  ;;  %1666 = vmatprep.subr.mxu1 %v2124_v0  ;;  %v730_v16 = vld [vmem:[#allocation7 + $0x58] sm:$0xff] }
  0x4d   :  { %1677 = vmatprep.subr.mxu0 %v2124_v0  ;;  %1667 = vmatpush3.msra.mxu1 %v271_v50  ;;  %v2650_v50 = vsub.f32 %v724_v7, %v2643_v33 }
  0x4e   :  { %1678 = vmatpush3.msra.mxu0 %v2194_v18  ;;  %1668 = vmatprep.subr.mxu1 %v2124_v0 }
  0x4f   :  { %1679 = vmatprep.subr.mxu0 %v2124_v0  ;;  %1669 = vmatpush3.msra.mxu1 %v278_v51  ;;  %v2652_v51 = vand.u32 4294901760, %v723_v36 }
  0x50   :  { %1680 = vmatpush3.msra.mxu0 %v2198_v20  ;;  %1671 = vmatmul.mubr.f32.vlgmr.msra.gmra.mxu1 %v2276_v62 }
  0x51   :  { %1681 = vmatprep.subr.mxu0 %v2124_v0  ;;  %1708 = vmatprep.subr.mxu1 %v2124_v0 }
  0x52   :  { %1682 = vmatpush3.msra.mxu0 %v2201_v21  ;;  %1709 = vmatpush3.msra.mxu1 %v2172_v4  ;;  %v2550_v21 = vand.u32 4294901760, %v731_v15 }
  0x53   :  { %1683 = vmatprep.subr.mxu0 %v2124_v0  ;;  %1710 = vmatprep.subr.mxu1 %v2124_v0 }
  0x54   :  { %1684 = vmatpush3.msra.mxu0 %v2215_v30  ;;  %1711 = vmatpush3.msra.mxu1 %v2174_v5 }
  0x55   :  { %1685 = vmatprep.subr.mxu0 %v2124_v0  ;;  %1712 = vmatprep.subr.mxu1 %v2124_v0 }
  0x56   :  { %1686 = vmatpush3.msra.mxu0 %v2228_v34  ;;  %1713 = vmatpush3.msra.mxu1 %v2176_v6 }
  0x57   :  { %1687 = vmatprep.subr.mxu0 %v2124_v0  ;;  %1714 = vmatprep.subr.mxu1 %v2124_v0 }
  0x58   :  { %1688 = vmatpush3.msra.mxu0 %v2243_v43  ;;  %1715 = vmatpush3.msra.mxu1 %v2178_v10 }
  0x59   :  { %1689 = vmatprep.subr.mxu0 %v2124_v0  ;;  %1716 = vmatprep.subr.mxu1 %v2124_v0 }
  0x5a   :  { %1690 = vmatpush3.msra.mxu0 %v2250_v47  ;;  %1717 = vmatpush3.msra.mxu1 %v2180_v11 }
  0x5b   :  { %1691 = vmatprep.subr.mxu0 %v2124_v0  ;;  %1718 = vmatprep.subr.mxu1 %v2124_v0 }
  0x5c   :  { %1692 = vmatpush3.msra.mxu0 %v2262_v55  ;;  %1719 = vmatpush3.msra.mxu1 %v2182_v12 }
  0x5d   :  { %1693 = vmatprep.subr.mxu0 %v2124_v0  ;;  %1720 = vmatprep.subr.mxu1 %v2124_v0 }
  0x5e   :  { %1694 = vmatpush3.msra.mxu0 %v2274_v61  ;;  %1721 = vmatpush3.msra.mxu1 %v2191_v17 }
  0x5f   :  { %1695 = vmatprep.subr.mxu0 %v2124_v0  ;;  %1722 = vmatprep.subr.mxu1 %v2124_v0 }
  0x60   :  { %1696 = vmatpush3.msra.mxu0 %v2288_v8  ;;  %1723 = vmatpush3.msra.mxu1 %v2207_v25 }
  0x61   :  { %1697 = vmatprep.subr.mxu0 %v2124_v0  ;;  %1724 = vmatprep.subr.mxu1 %v2124_v0 }
  0x62   :  { %1698 = vmatpush3.msra.mxu0 %v2303_v31  ;;  %1725 = vmatpush3.msra.mxu1 %v2211_v28 }
  0x63   :  { %1699 = vmatprep.subr.mxu0 %v2124_v0  ;;  %1726 = vmatprep.subr.mxu1 %v2124_v0 }
  0x64   :  { %1700 = vmatpush3.msra.mxu0 %v2315_v38  ;;  %1727 = vmatpush3.msra.mxu1 %v2231_v35 }
  0x65   :  { %1701 = vmatprep.subr.mxu0 %v2124_v0  ;;  %1728 = vmatprep.subr.mxu1 %v2124_v0 }
  0x66   :  { %1702 = vmatpush3.msra.mxu0 %v2326_v49  ;;  %1729 = vmatpush3.msra.mxu1 %v2246_v45 }
  0x67   :  { %1703 = vmatprep.subr.mxu0 %v2124_v0  ;;  %1730 = vmatprep.subr.mxu1 %v2124_v0 }
  0x68   :  { %1704 = vmatpush3.msra.mxu0 %v2336_v54  ;;  %1705 = vmatprep.mubr.msk.f32.mxu0 %vm2125_vm0, %v2124_v0 }
  0x69   :  { %1731 = vmatpush3.msra.mxu1 %v2254_v48  ;;  %1706 = vmatmul.mubr.f32.vlgmr.msra.gmra.mxu0 %v2300_v26 }
  0x6a   :  { %1732 = vmatprep.subr.mxu1 %v2124_v0  ;;  %1743 = vmatprep.subr.mxu0 %v2124_v0 }
  0x6b   :  { %1733 = vmatpush3.msra.mxu1 %v2271_v59  ;;  %1744 = vmatpush3.msra.mxu0 %v171_v22  ;;  %v729_v22 = vld [vmem:[#allocation7 + $0x50] sm:$0xff] }
  0x6c   :  { %1734 = vmatprep.subr.mxu1 %v2124_v0  ;;  %1745 = vmatprep.subr.mxu0 %v2124_v0 }
  0x6d   :  { %1735 = vmatpush3.msra.mxu1 %v2280_v63  ;;  %1746 = vmatpush3.msra.mxu0 %v178_v23  ;;  %v728_v23 = vld [vmem:[#allocation7 + $0x48] sm:$0xff] }
  0x6e   :  { %1736 = vmatprep.subr.mxu1 %v2124_v0  ;;  %1747 = vmatprep.subr.mxu0 %v2124_v0 }
  0x6f   :  { %1737 = vmatpush3.msra.mxu1 %v2295_v13  ;;  %1748 = vmatpush3.msra.mxu0 %v185_v24  ;;  %v727_v24 = vld [vmem:[#allocation7 + $0x40] sm:$0xff] }
  0x70   :  { %1738 = vmatprep.subr.mxu1 %v2124_v0  ;;  %1749 = vmatprep.subr.mxu0 %v2124_v0 }
  0x71   :  { %1739 = vmatpush3.msra.mxu1 %v2307_v32  ;;  %1740 = vmatprep.mubr.msk.f32.mxu1 %vm2125_vm0, %v2124_v0 }
  0x72   :  { %1750 = vmatpush3.msra.mxu0 %v192_v27  ;;  %1741 = vmatmul.mubr.f32.vlgmr.msra.gmra.mxu1 %v160_v42  ;;  %v2555_v27 = vand.u32 4294901760, %v729_v22 }
  0x73   :  { %1751 = vmatprep.subr.mxu0 %v2124_v0  ;;  %1778 = vmatprep.subr.mxu1 %v2124_v0 }
  0x74   :  { %1752 = vmatpush3.msra.mxu0 %v199_v29  ;;  %1779 = vmatpush3.msra.mxu1 %v2172_v4  ;;  %v734_v4 = vld [vmem:[#allocation7 + $0x78] sm:$0xff]  ;;  %v2560_v29 = vand.u32 4294901760, %v727_v24 }
  0x75   :  { %1753 = vmatprep.subr.mxu0 %v2124_v0  ;;  %1780 = vmatprep.subr.mxu1 %v2124_v0 }
  0x76   :  { %1754 = vmatpush3.msra.mxu0 %v206_v40  ;;  %1781 = vmatpush3.msra.mxu1 %v2174_v5  ;;  %v2535_v5 = vand.u32 4294901760, %v734_v4  ;;  %v2570_v40 = vsub.f32 %v731_v15, %v2550_v21  ;;  %v2584_v47 = vsub.f32 %v727_v24, %v2560_v29  ;;  %v2662_v15 = vsub.f32 %v723_v36, %v2652_v51 }
  0x77   :  { %1755 = vmatprep.subr.mxu0 %v2124_v0  ;;  %1782 = vmatprep.subr.mxu1 %v2124_v0 }
  0x78   :  { %1756 = vmatpush3.msra.mxu0 %v213_v46  ;;  %1783 = vmatpush3.msra.mxu1 %v2176_v6  ;;  %v733_v6 = vld [vmem:[#allocation7 + $0x70] sm:$0xff]  ;;  %v878_v31 = vand.u32 4294901760, %v2584_v47 }
  0x79   :  { %1757 = vmatprep.subr.mxu0 %v2124_v0  ;;  %1784 = vmatprep.subr.mxu1 %v2124_v0 }
  0x7a   :  { %1758 = vmatpush3.msra.mxu0 %v220_v53  ;;  %1785 = vmatpush3.msra.mxu1 %v2178_v10  ;;  %v2538_v10 = vsub.f32 %v734_v4, %v2535_v5  ;;  %v879_v56 = vsub.f32 %v2584_v47, %v878_v31  ;;  %v722_v4 = vld [vmem:[#allocation7 + $0x18] sm:$0xff] }
  0x7b   :  { %1759 = vmatprep.subr.mxu0 %v2124_v0  ;;  %1786 = vmatprep.subr.mxu1 %v2124_v0 }
  0x7c   :  { %1760 = vmatpush3.msra.mxu0 %v227_v57  ;;  %1787 = vmatpush3.msra.mxu1 %v2180_v11  ;;  %v2540_v11 = vand.u32 4294901760, %v733_v6 }
  0x7d   :  { %1761 = vmatprep.subr.mxu0 %v2124_v0  ;;  %1788 = vmatprep.subr.mxu1 %v2124_v0 }
  0x7e   :  { %1762 = vmatpush3.msra.mxu0 %v234_v3  ;;  %1789 = vmatpush3.msra.mxu1 %v2182_v12  ;;  %v732_v12 = vld [vmem:[#allocation7 + $0x68] sm:$0xff]  ;;  %v2546_v18 = vsub.f32 %v733_v6, %v2540_v11  ;;  %v893_v6 = vsub.f32 %v2641_v14, %v892_v41 }
  0x7f   :  { %1763 = vmatprep.subr.mxu0 %v2124_v0  ;;  %1790 = vmatprep.subr.mxu1 %v2124_v0  ;;  %v2548_v20 = vand.u32 4294901760, %v732_v12 }
  0x80   :  { %1764 = vmatpush3.msra.mxu0 %v241_v19  ;;  %1791 = vmatpush3.msra.mxu1 %v2191_v17  ;;  %v829_v17 = vand.u32 4294901760, %v2538_v10  ;;  %v836_v34 = vand.u32 4294901760, %v2546_v18 }
  0x81   :  { %1765 = vmatprep.subr.mxu0 %v2124_v0  ;;  %1792 = vmatprep.subr.mxu1 %v2124_v0 }
  0x82   :  { %1766 = vmatpush3.msra.mxu0 %v248_v37  ;;  %1793 = vmatpush3.msra.mxu1 %v2207_v25  ;;  %v2553_v25 = vand.u32 4294901760, %v730_v16  ;;  %v830_v30 = vsub.f32 %v2538_v10, %v829_v17  ;;  %v837_v55 = vsub.f32 %v2546_v18, %v836_v34 }
  0x83   :  { %1767 = vmatprep.subr.mxu0 %v2124_v0  ;;  %1794 = vmatprep.subr.mxu1 %v2124_v0 }
  0x84   :  { %1768 = vmatpush3.msra.mxu0 %v255_v44  ;;  %1795 = vmatpush3.msra.mxu1 %v2211_v28  ;;  %v2558_v28 = vand.u32 4294901760, %v728_v23  ;;  %v2574_v43 = vsub.f32 %v730_v16, %v2553_v25  ;;  %v831_v53 = vand.u32 4294901760, %v830_v30  ;;  %v838_v3 = vand.u32 4294901760, %v837_v55  ;;  %v720_v55 = vld [vmem:[#allocation7 + $0x8] sm:$0xff] }
  0x85   :  { %1769 = vmatprep.subr.mxu0 %v2124_v0  ;;  %1796 = vmatprep.subr.mxu1 %v2124_v0  ;;  %v2664_v16 = vand.u32 4294901760, %v722_v4  ;;  %v906_v30 = vand.u32 4294901760, %v2662_v15 }
  0x86   :  { %1770 = vmatpush3.msra.mxu0 %v262_v52  ;;  %1797 = vmatpush3.msra.mxu1 %v2231_v35  ;;  %v2567_v35 = vsub.f32 %v732_v12, %v2548_v20  ;;  %v2580_v46 = vsub.f32 %v728_v23, %v2558_v28  ;;  %v857_v61 = vand.u32 4294901760, %v2574_v43  ;;  %v899_v12 = vand.u32 4294901760, %v2650_v50 }
  0x87   :  { %1771 = vmatprep.subr.mxu0 %v2124_v0  ;;  %1798 = vmatprep.subr.mxu1 %v2124_v0  ;;  %v894_v23 = vand.u32 4294901760, %v893_v6 }
  0x88   :  { %1772 = vmatpush3.msra.mxu0 %v269_v1  ;;  %1799 = vmatpush3.msra.mxu1 %v2246_v45  ;;  %v2577_v45 = vsub.f32 %v729_v22, %v2555_v27  ;;  %v843_v57 = vand.u32 4294901760, %v2567_v35  ;;  %v858_v26 = vsub.f32 %v2574_v43, %v857_v61  ;;  %v721_v22 = vld [vmem:[#allocation7 + $0x10] sm:$0xff]  ;;  %v900_v24 = vsub.f32 %v2650_v50, %v899_v12 }
  0x89   :  { %1773 = vmatprep.subr.mxu0 %v2124_v0  ;;  %1800 = vmatprep.subr.mxu1 %v2124_v0 }
  0x8a   :  { %1774 = vmatpush3.msra.mxu0 %v276_v9  ;;  %1775 = vmatprep.mubr.msk.f32.mxu0 %vm2125_vm0, %v2124_v0  ;;  %v844_v8 = vsub.f32 %v2567_v35, %v843_v57  ;;  %v859_v44 = vand.u32 4294901760, %v858_v26  ;;  %v880_v9 = vand.u32 4294901760, %v879_v56  ;;  %v2685_v26 = vand.u32 4294901760, %v720_v55 }
  0x8b   :  { %1801 = vmatpush3.msra.mxu1 %v2254_v48  ;;  %1776 = vmatmul.mubr.f32.vlgmr.msra.gmra.mxu0 %v2276_v62  ;;  %v726_v48 = vld [vmem:[#allocation7 + $0x38] sm:$0xff] }
  0x8c   :  { %1802 = vmatprep.subr.mxu1 %v2124_v0  ;;  %1810 = vmatprep.mubr.msk.f32.mxu1 %vm2125_vm0, %v2124_v0  ;;  %v2603_v19 = vand.u32 4294901760, %v726_v48 }
  0x8d   :  { %1803 = vmatpush3.msra.mxu1 %v2271_v59  ;;  %1813 = vmatprep.subr.mxu0 %v2124_v0  ;;  %v850_v59 = vand.u32 4294901760, %v2570_v40 }
  0x8e   :  { %1804 = vmatprep.subr.mxu1 %v2124_v0  ;;  %1845 = vmatprep.mubr.msk.f32.mxu0 %vm2125_vm0, %v2124_v0  ;;  %v2614_v42 = vsub.f32 %v726_v48, %v2603_v19  ;;  %v2674_v48 = vsub.f32 %v722_v4, %v2664_v16 }
  0x8f   :  { %1805 = vmatpush3.msra.mxu1 %v2280_v63  ;;  %1814 = vmatpush3.msra.mxu0 %v2535_v5  ;;  %v871_v63 = vand.u32 4294901760, %v2580_v46 }
  0x90   :  { %1806 = vmatprep.subr.mxu1 %v2124_v0  ;;  %1815 = vmatprep.subr.mxu0 %v2124_v0  ;;  %v885_v52 = vand.u32 4294901760, %v2614_v42 }
  0x91   :  { %1807 = vmatpush3.msra.mxu1 %v2295_v13  ;;  %1816 = vmatpush3.msra.mxu0 %v2540_v11  ;;  %v851_v13 = vsub.f32 %v2570_v40, %v850_v59  ;;  %v872_v49 = vsub.f32 %v2580_v46, %v871_v63 }
  0x92   :  { %1808 = vmatprep.subr.mxu1 %v2124_v0  ;;  %1817 = vmatprep.subr.mxu0 %v2124_v0  ;;  %v886_v1 = vsub.f32 %v2614_v42, %v885_v52 }
  0x93   :  { %1809 = vmatpush3.msra.mxu1 %v2307_v32  ;;  %1818 = vmatpush3.msra.mxu0 %v2548_v20  ;;  %v845_v32 = vand.u32 4294901760, %v844_v8  ;;  %v852_v37 = vand.u32 4294901760, %v851_v13  ;;  %v873_v60 = vand.u32 4294901760, %v872_v49  ;;  %v907_v8 = vsub.f32 %v2662_v15, %v906_v30 }
  0x94   :  { %1811 = vmatmul.mubr.f32.vlgmr.msra.gmra.mxu1 %v2276_v62  ;;  %1848 = vmatprep.subr.mxu1 %v2124_v0  ;;  %v864_v62 = vand.u32 4294901760, %v2577_v45  ;;  %v887_v39 = vand.u32 4294901760, %v886_v1  ;;  %v913_v13 = vand.u32 4294901760, %v2674_v48  ;;  %v2697_v49 = vsub.f32 %v720_v55, %v2685_v26 }
  0x95   :  { %1880 = vmatprep.mubr.msk.f32.mxu1 %vm2125_vm0, %v2124_v0  ;;  %1819 = vmatprep.subr.mxu0 %v2124_v0 }
  0x96   :  { %1820 = vmatpush3.msra.mxu0 %v2550_v21  ;;  %1849 = vmatpush3.msra.mxu1 %v831_v53  ;;  %v865_v38 = vsub.f32 %v2577_v45, %v864_v62  ;;  %v2678_v53 = vand.u32 4294901760, %v721_v22 }
  0x97   :  { %1821 = vmatprep.subr.mxu0 %v2124_v0  ;;  %1850 = vmatprep.subr.mxu1 %v2124_v0 }
  0x98   :  { %1822 = vmatpush3.msra.mxu0 %v2553_v25  ;;  %1851 = vmatpush3.msra.mxu1 %v838_v3  ;;  %v866_v54 = vand.u32 4294901760, %v865_v38  ;;  %v901_v3 = vand.u32 4294901760, %v900_v24  ;;  %v908_v38 = vand.u32 4294901760, %v907_v8 }
  0x99   :  { %1823 = vmatprep.subr.mxu0 %v2124_v0  ;;  %1852 = vmatprep.subr.mxu1 %v2124_v0 }
  0x9a   :  { %1824 = vmatpush3.msra.mxu0 %v2555_v27  ;;  %1853 = vmatpush3.msra.mxu1 %v845_v32  ;;  %v2690_v32 = vsub.f32 %v721_v22, %v2678_v53 }
  0x9b   :  { %1825 = vmatprep.subr.mxu0 %v2124_v0  ;;  %1854 = vmatprep.subr.mxu1 %v2124_v0 }
  0x9c   :  { %1826 = vmatpush3.msra.mxu0 %v2558_v28  ;;  %1855 = vmatpush3.msra.mxu1 %v852_v37  ;;  %v719_v37 = vld [vmem:[#allocation7] sm:$0xff]  ;;  %v2910_v56 = vand.u32 4294901760, %v2690_v32 }
  0x9d   :  { %1827 = vmatprep.subr.mxu0 %v2124_v0  ;;  %1856 = vmatprep.subr.mxu1 %v2124_v0 }
  0x9e   :  { %1828 = vmatpush3.msra.mxu0 %v2560_v29  ;;  %1857 = vmatpush3.msra.mxu1 %v859_v44  ;;  %v914_v44 = vsub.f32 %v2674_v48, %v913_v13  ;;  %v921_v7 = vsub.f32 %v2690_v32, %v2910_v56 }
  0x9f   :  { %1829 = vmatprep.subr.mxu0 %v2124_v0  ;;  %1858 = vmatprep.subr.mxu1 %v2124_v0 }
  0xa0   :  { %1830 = vmatpush3.msra.mxu0 %v2603_v19  ;;  %1859 = vmatpush3.msra.mxu1 %v866_v54  ;;  %v2699_v54 = vand.u32 4294901760, %v719_v37  ;;  %v915_v58 = vand.u32 4294901760, %v914_v44 }
  0xa1   :  { %1831 = vmatprep.subr.mxu0 %v2124_v0  ;;  %1860 = vmatprep.subr.mxu1 %v2124_v0 }
  0xa2   :  { %1832 = vmatpush3.msra.mxu0 %v2635_v2  ;;  %1861 = vmatpush3.msra.mxu1 %v873_v60  ;;  %v2909_v60 = vand.u32 4294901760, %v2697_v49  ;;  %v2707_v1 = vsub.f32 %v719_v37, %v2699_v54 }
  0xa3   :  { %1833 = vmatprep.subr.mxu0 %v2124_v0  ;;  %1862 = vmatprep.subr.mxu1 %v2124_v0 }
  0xa4   :  { %1834 = vmatpush3.msra.mxu0 %v2643_v33  ;;  %1863 = vmatpush3.msra.mxu1 %v880_v9  ;;  %v928_v9 = vsub.f32 %v2697_v49, %v2909_v60  ;;  %v2908_v36 = vand.u32 4294901760, %v2707_v1 }
  0xa5   :  { %1835 = vmatprep.subr.mxu0 %v2124_v0  ;;  %1864 = vmatprep.subr.mxu1 %v2124_v0 }
  0xa6   :  { %1836 = vmatpush3.msra.mxu0 %v2652_v51  ;;  %1865 = vmatpush3.msra.mxu1 %v887_v39  ;;  %v922_v39 = vand.u32 4294901760, %v921_v7  ;;  %v929_v4 = vand.u32 4294901760, %v928_v9  ;;  %v935_v6 = vsub.f32 %v2707_v1, %v2908_v36 }
  0xa7   :  { %1837 = vmatprep.subr.mxu0 %v2124_v0  ;;  %1866 = vmatprep.subr.mxu1 %v2124_v0 }
  0xa8   :  { %1838 = vmatpush3.msra.mxu0 %v2664_v16  ;;  %1867 = vmatpush3.msra.mxu1 %v894_v23  ;;  %v936_v22 = vand.u32 4294901760, %v935_v6 }
  0xa9   :  { %1839 = vmatprep.subr.mxu0 %v2124_v0  ;;  %1868 = vmatprep.subr.mxu1 %v2124_v0 }
  0xaa   :  { %1840 = vmatpush3.msra.mxu0 %v2678_v53  ;;  %1869 = vmatpush3.msra.mxu1 %v901_v3 }
  0xab   :  { %1841 = vmatprep.subr.mxu0 %v2124_v0  ;;  %1870 = vmatprep.subr.mxu1 %v2124_v0 }
  0xac   :  { %1842 = vmatpush3.msra.mxu0 %v2685_v26  ;;  %1871 = vmatpush3.msra.mxu1 %v908_v38 }
  0xad   :  { %1843 = vmatprep.subr.mxu0 %v2124_v0  ;;  %1872 = vmatprep.subr.mxu1 %v2124_v0 }
  0xae   :  { %1844 = vmatpush3.msra.mxu0 %v2699_v54  ;;  %1873 = vmatpush3.msra.mxu1 %v915_v58 }
  0xaf   :  { %1883 = vmatprep.subr.mxu0 %v2124_v0  ;;  %1874 = vmatprep.subr.mxu1 %v2124_v0 }
  0xb0   :  { %1875 = vmatpush3.msra.mxu1 %v922_v39 }
  0xb1   :  { %1876 = vmatprep.subr.mxu1 %v2124_v0 }
  0xb2   :  { %1877 = vmatpush3.msra.mxu1 %v929_v4 }
  0xb3   :  { %1878 = vmatprep.subr.mxu1 %v2124_v0 }
  0xb4   :  { %1879 = vmatpush3.msra.mxu1 %v936_v22 }
  0xb5   :  { %1918 = vmatprep.subr.mxu1 %v2124_v0 }
 0x109   :  { %v164_v23 = vpop.f32.mrf.mxu0 }
 0x10b   :  { %v1637_v24 = vpop.f32.mrf.mxu0 }
 0x110   :  { %v315_v55 = vpop.f32.mrf.mxu1 }
 0x111   :  { %v316_v7 = vadd.f32 %v315_v55, %v164_v23 }
 0x112   :  { %v1672_v3 = vpop.f32.mrf.mxu1 }
 0x129   :  { %v419_v8 = vpop.f32.mrf.mxu0 }
 0x12a   :  { %v420_v39 = vadd.f32 %v419_v8, %v316_v7 }
 0x12b   :  { %v1707_v37 = vpop.f32.mrf.mxu0 }
 0x132   :  { %v508_v38 = vpop.f32.mrf.mxu1 }
 0x133   :  { %v509_v36 = vadd.f32 %v508_v38, %v420_v39 }
 0x134   :  { %v1742_v44 = vpop.f32.mrf.mxu1 }
 0x14b   :  { %v627_v58 = vpop.f32.mrf.mxu0 }
 0x14c   :  { %v628_v6 = vadd.f32 %v627_v58, %v509_v36 }
 0x14d   :  { %v1777_v9 = vpop.f32.mrf.mxu0 }
 0x154   :  { %v714_v4 = vpop.f32.mrf.mxu1 }
 0x155   :  { %v2727_v60 = vadd.f32 %v714_v4, %v628_v6 }
 0x156   :  { %v1812_v22 = vpop.f32.mrf.mxu1 }
 0x157   :  { %v718_v56 = vmul.f32 %v2727_v60, %v2727_v60 }
 0x159   :  { %v2731_v24 = vand.u32 4294901760, %v718_v56 }
 0x15b   :  { %v2734_v3 = vsub.f32 %v718_v56, %v2731_v24  ;;  %1881 = vmatmul.mubr.f32.vlgmr.msra.gmra.mxu1 %v2731_v24 }
 0x15c   :  { %1919 = vmatpush3.msra.mxu1 %v2535_v5  ;;  %1950 = vmatprep.mubr.msk.f32.mxu1 %vm2125_vm0, %v2124_v0 }
 0x15d   :  { %v818_v36 = vand.u32 4294901760, %v2734_v3  ;;  %1920 = vmatprep.subr.mxu1 %v2124_v0 }
 0x15e   :  { %1921 = vmatpush3.msra.mxu1 %v2540_v11 }
 0x15f   :  { %1922 = vmatprep.subr.mxu1 %v2124_v0  ;;  %v819_v23 = vsub.f32 %v2734_v3, %v818_v36 }
 0x160   :  { %1923 = vmatpush3.msra.mxu1 %v2548_v20 }
 0x161   :  { %1924 = vmatprep.subr.mxu1 %v2124_v0  ;;  %v820_v56 = vand.u32 4294901760, %v819_v23 }
 0x162   :  { %1925 = vmatpush3.msra.mxu1 %v2550_v21 }
 0x163   :  { %1926 = vmatprep.subr.mxu1 %v2124_v0  ;;  %1846 = vmatmul.mubr.f32.vlgmr.msra.gmra.mxu0 %v820_v56 }
 0x164   :  { %1884 = vmatpush3.msra.mxu0 %v2538_v10  ;;  %1927 = vmatpush3.msra.mxu1 %v2553_v25  ;;  %v2912_v10 = vand.u32 4294901760, %v2697_v49 }
 0x165   :  { %1885 = vmatprep.subr.mxu0 %v2124_v0  ;;  %1928 = vmatprep.subr.mxu1 %v2124_v0 }
 0x166   :  { %1886 = vmatpush3.msra.mxu0 %v2546_v18  ;;  %1929 = vmatpush3.msra.mxu1 %v2555_v27 }
 0x167   :  { %1887 = vmatprep.subr.mxu0 %v2124_v0  ;;  %1930 = vmatprep.subr.mxu1 %v2124_v0 }
 0x168   :  { %1888 = vmatpush3.msra.mxu0 %v2567_v35  ;;  %1931 = vmatpush3.msra.mxu1 %v2558_v28 }
 0x169   :  { %1889 = vmatprep.subr.mxu0 %v2124_v0  ;;  %1932 = vmatprep.subr.mxu1 %v2124_v0 }
 0x16a   :  { %1890 = vmatpush3.msra.mxu0 %v2570_v40  ;;  %1933 = vmatpush3.msra.mxu1 %v2560_v29 }
 0x16b   :  { %1891 = vmatprep.subr.mxu0 %v2124_v0  ;;  %1934 = vmatprep.subr.mxu1 %v2124_v0 }
 0x16c   :  { %1892 = vmatpush3.msra.mxu0 %v2574_v43  ;;  %1935 = vmatpush3.msra.mxu1 %v2603_v19 }
 0x16d   :  { %1893 = vmatprep.subr.mxu0 %v2124_v0  ;;  %1936 = vmatprep.subr.mxu1 %v2124_v0 }
 0x16e   :  { %1894 = vmatpush3.msra.mxu0 %v2577_v45  ;;  %1937 = vmatpush3.msra.mxu1 %v2635_v2 }
 0x16f   :  { %1895 = vmatprep.subr.mxu0 %v2124_v0  ;;  %1938 = vmatprep.subr.mxu1 %v2124_v0 }
 0x170   :  { %1896 = vmatpush3.msra.mxu0 %v2580_v46  ;;  %1939 = vmatpush3.msra.mxu1 %v2643_v33 }
 0x171   :  { %1897 = vmatprep.subr.mxu0 %v2124_v0  ;;  %1940 = vmatprep.subr.mxu1 %v2124_v0 }
 0x172   :  { %1898 = vmatpush3.msra.mxu0 %v2584_v47  ;;  %1941 = vmatpush3.msra.mxu1 %v2652_v51 }
 0x173   :  { %1899 = vmatprep.subr.mxu0 %v2124_v0  ;;  %1942 = vmatprep.subr.mxu1 %v2124_v0 }
 0x174   :  { %1900 = vmatpush3.msra.mxu0 %v2614_v42  ;;  %1943 = vmatpush3.msra.mxu1 %v2664_v16 }
 0x175   :  { %1901 = vmatprep.subr.mxu0 %v2124_v0  ;;  %1944 = vmatprep.subr.mxu1 %v2124_v0 }
 0x176   :  { %1902 = vmatpush3.msra.mxu0 %v2641_v14  ;;  %1945 = vmatpush3.msra.mxu1 %v2678_v53 }
 0x177   :  { %1903 = vmatprep.subr.mxu0 %v2124_v0  ;;  %1946 = vmatprep.subr.mxu1 %v2124_v0 }
 0x178   :  { %1904 = vmatpush3.msra.mxu0 %v2650_v50  ;;  %1947 = vmatpush3.msra.mxu1 %v2685_v26 }
 0x179   :  { %1905 = vmatprep.subr.mxu0 %v2124_v0  ;;  %1948 = vmatprep.subr.mxu1 %v2124_v0 }
 0x17a   :  { %1906 = vmatpush3.msra.mxu0 %v2662_v15  ;;  %1949 = vmatpush3.msra.mxu1 %v2699_v54 }
 0x17b   :  { %1907 = vmatprep.subr.mxu0 %v2124_v0  ;;  %1951 = vmatmul.mubr.f32.vlgmr.msra.gmra.mxu1 %v818_v36 }
 0x17c   :  { %1988 = vmatprep.subr.mxu1 %v2124_v0  ;;  %1908 = vmatpush3.msra.mxu0 %v2674_v48 }
 0x17d   :  { %1989 = vmatpush3.msra.mxu1 %v2535_v5  ;;  %1909 = vmatprep.subr.mxu0 %v2124_v0  ;;  %v2911_v5 = vand.u32 4294901760, %v2690_v32 }
 0x17e   :  { %1990 = vmatprep.subr.mxu1 %v2124_v0  ;;  %1910 = vmatpush3.msra.mxu0 %v2690_v32 }
 0x17f   :  { %1991 = vmatpush3.msra.mxu1 %v2540_v11  ;;  %1911 = vmatprep.subr.mxu0 %v2124_v0  ;;  %v2913_v11 = vand.u32 4294901760, %v2707_v1 }
 0x180   :  { %1992 = vmatprep.subr.mxu1 %v2124_v0  ;;  %1912 = vmatpush3.msra.mxu0 %v2697_v49 }
 0x181   :  { %1993 = vmatpush3.msra.mxu1 %v2548_v20  ;;  %1913 = vmatprep.subr.mxu0 %v2124_v0 }
 0x182   :  { %1994 = vmatprep.subr.mxu1 %v2124_v0  ;;  %1914 = vmatpush3.msra.mxu0 %v2707_v1 }
 0x183   :  { %1915 = vmatprep.mubr.msk.f32.mxu0 %vm2125_vm0, %v2124_v0  ;;  %1995 = vmatpush3.msra.mxu1 %v2550_v21 }
 0x184   :  { %1916 = vmatmul.mubr.f32.vlgmr.msra.gmra.mxu0 %v2734_v3  ;;  %1953 = vmatprep.subr.mxu0 %v2124_v0 }
 0x185   :  { %1996 = vmatprep.subr.mxu1 %v2124_v0  ;;  %1954 = vmatpush3.msra.mxu0 %v829_v17 }
 0x186   :  { %1997 = vmatpush3.msra.mxu1 %v2553_v25  ;;  %1955 = vmatprep.subr.mxu0 %v2124_v0 }
 0x187   :  { %1998 = vmatprep.subr.mxu1 %v2124_v0  ;;  %1956 = vmatpush3.msra.mxu0 %v836_v34 }
 0x188   :  { %1999 = vmatpush3.msra.mxu1 %v2555_v27  ;;  %1957 = vmatprep.subr.mxu0 %v2124_v0 }
 0x189   :  { %2000 = vmatprep.subr.mxu1 %v2124_v0  ;;  %1958 = vmatpush3.msra.mxu0 %v843_v57 }
 0x18a   :  { %2001 = vmatpush3.msra.mxu1 %v2558_v28  ;;  %1959 = vmatprep.subr.mxu0 %v2124_v0 }
 0x18b   :  { %2002 = vmatprep.subr.mxu1 %v2124_v0  ;;  %1960 = vmatpush3.msra.mxu0 %v850_v59 }
 0x18c   :  { %2003 = vmatpush3.msra.mxu1 %v2560_v29  ;;  %1961 = vmatprep.subr.mxu0 %v2124_v0 }
 0x18d   :  { %2004 = vmatprep.subr.mxu1 %v2124_v0  ;;  %1962 = vmatpush3.msra.mxu0 %v857_v61 }
 0x18e   :  { %2005 = vmatpush3.msra.mxu1 %v2603_v19  ;;  %1963 = vmatprep.subr.mxu0 %v2124_v0  ;;  %v1380_v19 = vld [vmem:[%s2906_s4] sm:$0x1] }
 0x18f   :  { %2006 = vmatprep.subr.mxu1 %v2124_v0  ;;  %1964 = vmatpush3.msra.mxu0 %v864_v62  ;;  %v1378_v62 = vld [vmem:[%s2905_s3] sm:$0x1] }
 0x190   :  { %2007 = vmatpush3.msra.mxu1 %v2635_v2  ;;  %1965 = vmatprep.subr.mxu0 %v2124_v0 }
 0x191   :  { %2008 = vmatprep.subr.mxu1 %v2124_v0  ;;  %1966 = vmatpush3.msra.mxu0 %v871_v63 }
 0x192   :  { %2009 = vmatpush3.msra.mxu1 %v2643_v33  ;;  %1967 = vmatprep.subr.mxu0 %v2124_v0 }
 0x193   :  { %2010 = vmatprep.subr.mxu1 %v2124_v0  ;;  %1968 = vmatpush3.msra.mxu0 %v878_v31 }
 0x194   :  { %2011 = vmatpush3.msra.mxu1 %v2652_v51  ;;  %1969 = vmatprep.subr.mxu0 %v2124_v0 }
 0x195   :  { %2012 = vmatprep.subr.mxu1 %v2124_v0  ;;  %1970 = vmatpush3.msra.mxu0 %v885_v52 }
 0x196   :  { %2013 = vmatpush3.msra.mxu1 %v2664_v16  ;;  %1971 = vmatprep.subr.mxu0 %v2124_v0 }
 0x197   :  { %2014 = vmatprep.subr.mxu1 %v2124_v0  ;;  %1972 = vmatpush3.msra.mxu0 %v892_v41 }
 0x198   :  { %2015 = vmatpush3.msra.mxu1 %v2678_v53  ;;  %1973 = vmatprep.subr.mxu0 %v2124_v0 }
 0x199   :  { %2016 = vmatprep.subr.mxu1 %v2124_v0  ;;  %1974 = vmatpush3.msra.mxu0 %v899_v12 }
 0x19a   :  { %2017 = vmatpush3.msra.mxu1 %v2685_v26  ;;  %1975 = vmatprep.subr.mxu0 %v2124_v0 }
 0x19b   :  { %2018 = vmatprep.subr.mxu1 %v2124_v0  ;;  %1976 = vmatpush3.msra.mxu0 %v906_v30 }
 0x19c   :  { %2019 = vmatpush3.msra.mxu1 %v2699_v54  ;;  %2020 = vmatprep.mubr.msk.f32.mxu1 %vm2125_vm0, %v2124_v0 }
 0x19d   :  { %1977 = vmatprep.subr.mxu0 %v2124_v0  ;;  %2021 = vmatmul.mubr.f32.vlgmr.msra.gmra.mxu1 %v2731_v24 }
 0x19e   :  { %1978 = vmatpush3.msra.mxu0 %v913_v13  ;;  %1985 = vmatprep.mubr.msk.f32.mxu0 %vm2125_vm0, %v2124_v0 }
 0x19f   :  { %1979 = vmatprep.subr.mxu0 %v2124_v0 }
 0x1a0   :  { %1980 = vmatpush3.msra.mxu0 %v2911_v5 }
 0x1a1   :  { %1981 = vmatprep.subr.mxu0 %v2124_v0 }
 0x1a2   :  { %1982 = vmatpush3.msra.mxu0 %v2912_v10 }
 0x1a3   :  { %1983 = vmatprep.subr.mxu0 %v2124_v0 }
 0x1a4   :  { %1984 = vmatpush3.msra.mxu0 %v2913_v11 }
 0x1a5   :  { %1986 = vmatmul.mubr.f32.vlgmr.msra.gmra.mxu0 %v2731_v24 }
 0x21b   :  { %v973_v17 = vpop.f32.mrf.mxu1 }
 0x21d   :  { %v1882_v18 = vpop.f32.mrf.mxu1 }
 0x223   :  { %v822_v20 = vpop.f32.mrf.mxu0 }
 0x224   :  { %v823_v34 = vadd.f32 1e-05, %v822_v20 }
 0x225   :  { %v1847_v21 = vpop.f32.mrf.mxu0 }
 0x226   :  { %v974_v40 = vadd.f32 %v973_v17, %v823_v34 }
 0x23b   :  { %v1166_v25 = vpop.f32.mrf.mxu1 }
 0x23d   :  { %v1952_v27 = vpop.f32.mrf.mxu1 }
 0x244   :  { %v1077_v28 = vpop.f32.mrf.mxu0 }
 0x245   :  { %v1078_v45 = vadd.f32 %v1077_v28, %v974_v40 }
 0x246   :  { %v1917_v29 = vpop.f32.mrf.mxu0 }
 0x247   :  { %v1167_v46 = vadd.f32 %v1166_v25, %v1078_v45 }
 0x25d   :  { %v1372_v35 = vpop.f32.mrf.mxu1 }
 0x25f   :  { %v2022_v43 = vpop.f32.mrf.mxu1 }
 0x265   :  { %v1285_v0 = vpop.f32.mrf.mxu0 }
 0x266   :  { %v1286_v47 = vadd.f32 %v1285_v0, %v1167_v46 }
 0x267   :  { %v1987_v57 = vpop.f32.mrf.mxu0 }
 0x268   :  { %v1373_v59 = vadd.f32 %v1372_v35, %v1286_v47 }
 0x26a   :  { %2031 = vrsqrt.f32 %v1373_v59 }
 0x277   :  { %v2032_v61 = vpop.eup %2031 }
 0x278   :  { %v1377_v63 = vmul.f32 %v2032_v61, %v2727_v60 }
 0x27a   :  { %v1379_v31 = vmul.f32 %v1378_v62, %v1377_v63 }
 0x27c   :  { %v1381_v42 = vadd.f32 %v1380_v19, %v1379_v31 }
 0x27e   :  { %1382 = vst [vmem:[#allocation8] sm:$0x1] %v1381_v42 }
 0x27f   :  { %2104 = shalt.err (!%p2101_p5)
}
 0x280   :  { %1392 = dma.vmem_to_hbm [thread:$0]  %s1390_s13, 16, %s2907_s5, [#allocation4]  }
 0x281   :  { %2117 = dma.done.wait [#allocation4], 16  }
 0x282   :  { %2118 = vsyncadd [#allocation4], 4294967280 }
 0x283   :  { %1396 = vsyncpa [#allocation3], 1 }
 0x284   :  { %1397 = vsyncpa [#allocation6], 1 }
 0x285   :  { %1398 = vsyncpa [#allocation4], 1 }

</bundles_post_ra>
